<compile_context>
chip_gen: v7x
topology: tpu7x:2x2x1
jax: 0.10.0
libtpu: 0.0.40
codegen_flags: <defaults>
</compile_context>

<pallas_src>
import jax
import jax.numpy as jnp
from jax import lax
from jax.experimental import pallas as pl
from jax.experimental.pallas import tpu as pltpu

EPS = 1e-5  # PyTorch LayerNorm default


def _layernorm(x, gamma, beta):
    # Two-pass stats (numerically stable; extra reduce hides under HBM slack).
    mu = jnp.mean(x, axis=-1, keepdims=True)
    xc = x - mu
    var = jnp.mean(xc * xc, axis=-1, keepdims=True)
    return xc * lax.rsqrt(var + EPS) * gamma + beta


# ---------------- Stage 1: node_res = Linear(LN(nodevec)) + LN(nodevec) ------
def node_res_kernel(nv_ref, wT_ref, b_ref, g_ref, be_ref, res_ref):
    nv = nv_ref[...].astype(jnp.float32)          # (rows, D)
    gamma = g_ref[...].astype(jnp.float32)        # (1, D)
    beta = be_ref[...].astype(jnp.float32)        # (1, D)
    nvn = _layernorm(nv, gamma, beta)
    res_ref[...] = (
        jnp.dot(nvn, wT_ref[...].astype(jnp.float32),
                preferred_element_type=jnp.float32)
        + b_ref[...].astype(jnp.float32)
        + nvn
    )


# ---------------- Stage 2: out = LN(time_node + node_res) --------------------
def fuse_kernel(tn_ref, res_ref, g_ref, be_ref, out_ref):
    gamma = g_ref[...].astype(jnp.float32)        # (1, D) -> broadcasts
    beta = be_ref[...].astype(jnp.float32)
    x = tn_ref[...].astype(jnp.float32) + res_ref[...][None, :, :]
    out_ref[...] = _layernorm(x, gamma, beta).astype(out_ref.dtype)


# ---------------- tiling helpers ---------------------------------------------
def _vmem_config():
    """(per-buffer tile budget, vmem_limit_bytes), sized to the TPU generation."""
    try:
        vmem = pltpu.get_tpu_info().vmem_capacity_bytes
    except Exception:          # conservative fallback if query unavailable
        vmem = 64 << 20
    if vmem >= (128 << 20):    # v5e / v6e: 128 MiB physical VMEM
        return 8 << 20, 64 << 20
    return 4 << 20, 32 << 20   # v7x: 64 MiB physical VMEM


def _choose_tiles(B, N, D, itemsize, budget_bytes, min_steps=2):
    """Pick (Bt, Nt) for a streamed (Bt, Nt, D) tile.

    * dtype-aware: BlockSpec buffers hold the streamed dtype.
    * no divisibility requirement (grid uses pl.cdiv; per-row LN tolerates the
      padded rows of a ragged last block, which are discarded on write).
    * if even a single (1, N, D) block exceeds the budget, tile N instead so
      pipelining stays 2-deep and the resident node_res slice shrinks too.
    * keep at least `min_steps` grid steps so both v7x TensorCores get work.
    """
    row_bytes = N * D * itemsize
    if row_bytes <= budget_bytes:
        nt = N
        bt = max(1, min(B, budget_bytes // row_bytes))
        while bt > 1 and pl.cdiv(B, bt) < min_steps:
            bt -= 1
    else:
        bt = 1
        nt = min(N, max(8, (budget_bytes // (D * itemsize)) // 8 * 8))
    return bt, nt


def gated_fusion_1(nodevec, time_node, w_weight, w_bias, norm_gamma, norm_beta):
    """nodevec: (N, D); time_node: (B, N, D) (or (N, D) for batch_size==1);
    w_weight: (D, D) [PyTorch layout, out_features x in_features];
    w_bias / norm_gamma / norm_beta: (D,)."""
    if time_node.ndim == 2:                # PyTorch batch_size==1 unsqueeze path
        time_node = time_node[None]
    B, N, D = time_node.shape

    wT = w_weight.T                        # kernel does nvn @ wT == Linear
    b2 = w_bias.reshape(1, D)
    g2 = norm_gamma.reshape(1, D)
    be2 = norm_beta.reshape(1, D)

    budget, vmem_limit = _vmem_config()

    # --- Stage 1 (runs once; row-tiled so big N also fits v7x VMEM) ----------
    rows = N if N <= 512 else 512          # 512 rows * D f32 stays tiny vs budget
    node_res = pl.pallas_call(
        node_res_kernel,
        out_shape=jax.ShapeDtypeStruct((N, D), jnp.float32),
        grid_spec=pltpu.PrefetchScalarGridSpec(
            num_scalar_prefetch=0,
            grid=(pl.cdiv(N, rows),),
            in_specs=[
                pl.BlockSpec((rows, D), lambda i: (i, 0)),   # nodevec rows
                pl.BlockSpec((D, D), lambda i: (0, 0)),      # W^T (resident)
                pl.BlockSpec((1, D), lambda i: (0, 0)),      # bias
                pl.BlockSpec((1, D), lambda i: (0, 0)),      # gamma
                pl.BlockSpec((1, D), lambda i: (0, 0)),      # beta
            ],
            out_specs=pl.BlockSpec((rows, D), lambda i: (i, 0)),
        ),
        compiler_params=pltpu.CompilerParams(
            dimension_semantics=("parallel",),
            vmem_limit_bytes=vmem_limit),
        cost_estimate=pl.CostEstimate(
            flops=2 * N * D * D + 10 * N * D,
            transcendentals=N,
            bytes_accessed=(2 * N * D + D * D + 3 * D) * 4),
    )(nodevec, wT, b2, g2, be2)

    # --- Stage 2 (memory-bound stream; tile batch and N) ---------------------
    itemsize = jnp.dtype(time_node.dtype).itemsize
    bt, nt = _choose_tiles(B, N, D, itemsize, budget)
    grid = (pl.cdiv(B, bt), pl.cdiv(N, nt))

    out = pl.pallas_call(
        fuse_kernel,
        out_shape=jax.ShapeDtypeStruct((B, N, D), time_node.dtype),
        grid_spec=pltpu.PrefetchScalarGridSpec(
            num_scalar_prefetch=0,
            grid=grid,
            in_specs=[
                pl.BlockSpec((bt, nt, D), lambda b, n: (b, n, 0)),  # time_node
                pl.BlockSpec((nt, D), lambda b, n: (n, 0)),         # node_res slice
                pl.BlockSpec((1, D), lambda b, n: (0, 0)),          # gamma
                pl.BlockSpec((1, D), lambda b, n: (0, 0)),          # beta
            ],
            out_specs=pl.BlockSpec((bt, nt, D), lambda b, n: (b, n, 0)),
        ),
        compiler_params=pltpu.CompilerParams(
            # No cross-step state: both axes can shard across TCs on v7x.
            dimension_semantics=("parallel", "parallel"),
            vmem_limit_bytes=vmem_limit),
        cost_estimate=pl.CostEstimate(
            flops=12 * B * N * D,
            transcendentals=B * N,
            bytes_accessed=2 * B * N * D * itemsize + N * D * 4),
    )(time_node, node_res, g2, be2)
    return out


def reference(nodevec, time_node, w_weight, w_bias, gamma, beta):
    def ln(x):
        mu = jnp.mean(x, axis=-1, keepdims=True)
        var = jnp.mean((x - mu) ** 2, axis=-1, keepdims=True)
        return (x - mu) / jnp.sqrt(var + EPS) * gamma + beta
    nvn = ln(nodevec)
    node_res = nvn @ w_weight.T + w_bias + nvn
    return ln(time_node + node_res[None, :, :])


if __name__ == "__main__":
    B, N, D = 2, 8, 32
    key = jax.random.PRNGKey(0)
    k1, k2, k3, k4 = jax.random.split(key, 4)

    nodevec = jax.random.normal(k1, (N, D), dtype=jnp.float32)
    time_node = jax.random.normal(k2, (B, N, D), dtype=jnp.float32)

    # Deterministic parameter init (synthetic; xavier-uniform-like for W).
    bound = (6.0 / (D + D)) ** 0.5 * 1.414
    w_weight = jax.random.uniform(k3, (D, D), minval=-bound, maxval=bound,
                                  dtype=jnp.float32)
    w_bias = jax.random.uniform(k4, (D,), minval=-0.1, maxval=0.1,
                                dtype=jnp.float32)
    norm_gamma = jnp.ones((D,), dtype=jnp.float32)   # PyTorch LayerNorm default
    norm_beta = jnp.zeros((D,), dtype=jnp.float32)

    out = gated_fusion_1(nodevec, time_node, w_weight, w_bias,
                         norm_gamma, norm_beta)
    out = jax.block_until_ready(out)

    ref = reference(nodevec, time_node, w_weight, w_bias, norm_gamma, norm_beta)
    assert out.shape == (B, N, D)
    assert jnp.allclose(out, ref, atol=1e-4, rtol=1e-4)
    print("KERNEL_OK")
</pallas_src>

<mosaic_0001>
module attributes {stable_mosaic.version = 11 : i64} {
  func.func @node_res_kernel(%arg0: i32, %arg1: memref<8x32xf32, #tpu.memory_space<vmem>>, %arg2: memref<32x32xf32, #tpu.memory_space<vmem>>, %arg3: memref<1x32xf32, #tpu.memory_space<vmem>>, %arg4: memref<1x32xf32, #tpu.memory_space<vmem>>, %arg5: memref<1x32xf32, #tpu.memory_space<vmem>>, %arg6: memref<8x32xf32, #tpu.memory_space<vmem>>) attributes {dimension_semantics = [#tpu.dimension_semantics<parallel>], iteration_bounds = array<i64: 1>, scalar_prefetch = 0 : i64, scratch_operands = 0 : i64, tpu.core_type = #tpu.core_type<tc>, window_params = [{transform_indices = @transform_0, window_bounds = array<i64: 8, 32>}, {pipeline_mode = #tpu.pipeline_mode<synchronous>, transform_indices = @transform_1, window_bounds = array<i64: 32, 32>}, {pipeline_mode = #tpu.pipeline_mode<synchronous>, transform_indices = @transform_2, window_bounds = array<i64: 1, 32>}, {pipeline_mode = #tpu.pipeline_mode<synchronous>, transform_indices = @transform_3, window_bounds = array<i64: 1, 32>}, {pipeline_mode = #tpu.pipeline_mode<synchronous>, transform_indices = @transform_4, window_bounds = array<i64: 1, 32>}, {transform_indices = @transform_5, window_bounds = array<i64: 8, 32>}]} {
    %c0 = arith.constant 0 : index
    %c0_0 = arith.constant 0 : index
    %0 = vector.load %arg1[%c0, %c0_0] : memref<8x32xf32, #tpu.memory_space<vmem>>, vector<8x32xf32>
    %c0_1 = arith.constant 0 : index
    %c0_2 = arith.constant 0 : index
    %1 = vector.load %arg4[%c0_1, %c0_2] : memref<1x32xf32, #tpu.memory_space<vmem>>, vector<1x32xf32>
    %c0_3 = arith.constant 0 : index
    %c0_4 = arith.constant 0 : index
    %2 = vector.load %arg5[%c0_3, %c0_4] : memref<1x32xf32, #tpu.memory_space<vmem>>, vector<1x32xf32>
    %cst = arith.constant dense<0.000000e+00> : vector<8xf32>
    %3 = vector.multi_reduction <add>, %0, %cst [1] : vector<8x32xf32> to vector<8xf32>
    %4 = vector.shape_cast %3 : vector<8xf32> to vector<8x1xf32>
    %cst_5 = arith.constant 3.200000e+01 : f32
    %5 = vector.broadcast %cst_5 : f32 to vector<8x1xf32>
    %6 = arith.divf %4, %5 : vector<8x1xf32>
    %7 = vector.broadcast %6 : vector<8x1xf32> to vector<8x32xf32>
    %8 = arith.subf %0, %7 : vector<8x32xf32>
    %9 = arith.mulf %8, %8 : vector<8x32xf32>
    %cst_6 = arith.constant dense<0.000000e+00> : vector<8xf32>
    %10 = vector.multi_reduction <add>, %9, %cst_6 [1] : vector<8x32xf32> to vector<8xf32>
    %11 = vector.shape_cast %10 : vector<8xf32> to vector<8x1xf32>
    %cst_7 = arith.constant 3.200000e+01 : f32
    %12 = vector.broadcast %cst_7 : f32 to vector<8x1xf32>
    %13 = arith.divf %11, %12 : vector<8x1xf32>
    %cst_8 = arith.constant 9.99999974E-6 : f32
    %14 = vector.broadcast %cst_8 : f32 to vector<8x1xf32>
    %15 = arith.addf %13, %14 : vector<8x1xf32>
    %16 = math.rsqrt %15 : vector<8x1xf32>
    %17 = vector.broadcast %16 : vector<8x1xf32> to vector<8x32xf32>
    %18 = arith.mulf %8, %17 : vector<8x32xf32>
    %19 = vector.broadcast %1 : vector<1x32xf32> to vector<8x32xf32>
    %20 = arith.mulf %18, %19 : vector<8x32xf32>
    %21 = vector.broadcast %2 : vector<1x32xf32> to vector<8x32xf32>
    %22 = arith.addf %20, %21 : vector<8x32xf32>
    %c0_9 = arith.constant 0 : index
    %c0_10 = arith.constant 0 : index
    %23 = vector.load %arg2[%c0_9, %c0_10] : memref<32x32xf32, #tpu.memory_space<vmem>>, vector<32x32xf32>
    %cst_11 = arith.constant dense<0.000000e+00> : vector<8x32xf32>
    %24 = tpu.matmul %22, %23, %cst_11 {dimension_numbers = #tpu.dot_dimension_numbers<[1], [0], [0], [1], [0, 0, 1, 1], [], []>} : vector<8x32xf32>, vector<32x32xf32>, vector<8x32xf32> -> vector<8x32xf32>
    %c0_12 = arith.constant 0 : index
    %c0_13 = arith.constant 0 : index
    %25 = vector.load %arg3[%c0_12, %c0_13] : memref<1x32xf32, #tpu.memory_space<vmem>>, vector<1x32xf32>
    %26 = vector.broadcast %25 : vector<1x32xf32> to vector<8x32xf32>
    %27 = arith.addf %24, %26 : vector<8x32xf32>
    %28 = arith.addf %27, %22 : vector<8x32xf32>
    %c0_14 = arith.constant 0 : index
    %c0_15 = arith.constant 0 : index
    %29 = vector.load %arg6[%c0_14, %c0_15] : memref<8x32xf32, #tpu.memory_space<vmem>>, vector<8x32xf32>
    tpu.vector_store %arg6[%c0_14, %c0_15], %28 {strides = array<i32>} : memref<8x32xf32, #tpu.memory_space<vmem>>, vector<8x32xf32>,
    return
  }
  func.func @transform_0(%arg0: i32) -> (i32, i32) {
    %c0_i32 = arith.constant 0 : i32
    %c0_i32_0 = arith.constant 0 : i32
    return %arg0, %c0_i32 : i32, i32
  }
  func.func @transform_1(%arg0: i32) -> (i32, i32) {
    %c0_i32 = arith.constant 0 : i32
    %c0_i32_0 = arith.constant 0 : i32
    %c0_i32_1 = arith.constant 0 : i32
    return %c0_i32, %c0_i32_0 : i32, i32
  }
  func.func @transform_2(%arg0: i32) -> (i32, i32) {
    %c0_i32 = arith.constant 0 : i32
    %c0_i32_0 = arith.constant 0 : i32
    %c0_i32_1 = arith.constant 0 : i32
    return %c0_i32, %c0_i32_0 : i32, i32
  }
  func.func @transform_3(%arg0: i32) -> (i32, i32) {
    %c0_i32 = arith.constant 0 : i32
    %c0_i32_0 = arith.constant 0 : i32
    %c0_i32_1 = arith.constant 0 : i32
    return %c0_i32, %c0_i32_0 : i32, i32
  }
  func.func @transform_4(%arg0: i32) -> (i32, i32) {
    %c0_i32 = arith.constant 0 : i32
    %c0_i32_0 = arith.constant 0 : i32
    %c0_i32_1 = arith.constant 0 : i32
    return %c0_i32, %c0_i32_0 : i32, i32
  }
  func.func @transform_5(%arg0: i32) -> (i32, i32) {
    %c0_i32 = arith.constant 0 : i32
    %c0_i32_0 = arith.constant 0 : i32
    return %arg0, %c0_i32 : i32, i32
  }
}

</mosaic_0001>

<bundles_post_ra>
// kernel: tpu_custom_call.1
= control target key start
LH: loop header
LB: loop body
LE: loop exit
PB: predicated region body
PF: predicated region fallthrough
CT: control target
= control target key end

     0   :  { %10 = vsyncpa [#allocation3], 0  ;;  %s383_s0 = inlined_call_operand.hbm [shape: f32[8,32], index: 0, kind: input, shape index: {}]   ;;  %s384_s1 = inlined_call_operand.hbm [shape: f32[32,32], index: 1, kind: input, shape index: {}]   ;;  %s385_s2 = inlined_call_operand.vmem [shape: f32[1,32], index: 2, kind: input, shape index: {}]   ;;  %s386_s3 = inlined_call_operand.vmem [shape: f32[1,32], index: 3, kind: input, shape index: {}]   ;;  %s387_s4 = inlined_call_operand.vmem [shape: f32[1,32], index: 4, kind: input, shape index: {}]   ;;  %s388_s5 = inlined_call_operand.hbm [shape: f32[8,32], index: 5, kind: output, shape index: {}]  }
   0x1   :  { %11 = vsyncpa [#allocation6], 0 }
   0x2   :  { %12 = vsyncpa [#allocation4], 0  ;;  %s289_s18 = smov [#allocation2]   ;;  %s290_s20 = smov [#allocation5]  }
   0x3   :  { %s19_s19 = sshll.u32 %s289_s18, 4  ;;  %s28_s21 = sshll.u32 %s290_s20, 4  ;;  %s20_s19 = int_to_ptr.vmem [resolvable:$true] %s19_s19  ;;  %s327_s21 = int_to_ptr.vmem [resolvable:$true] %s28_s21 }
   0x4   :  { %s217_s24 = scalar_lea.hbm %s383_s0, 128 }
   0x5   :  { %p218_p0 = scmp.ne.s32.totalorder %s383_s0, %s217_s24  ;;  %p221_p1 = scmp.lt.u32.totalorder %s217_s24, %s383_s0 }
   0x7   :  { %p223_p2 = pnand %p221_p1, %p218_p0 }
   0x9   :  { %226 = shalt.err (!%p223_p2)
}
   0xa   :  { %s227_s29 = scalar_lea.vmem %s20_s19, 128  ;;  %p232_p4 = scmp.lt.s32.totalorder %s20_s19, %s20_s19 }
   0xb   :  { %p228_p3 = scmp.ne.s32.totalorder %s20_s19, %s227_s29  ;;  %p233_p5 = scmp.lt.s32.totalorder %s227_s29, %s227_s29 }
   0xd   :  { %p234_p6 = por %p233_p5, %p232_p4 }
   0xf   :  { %p235_p7 = pnand %p234_p6, %p228_p3 }
  0x11   :  { %238 = shalt.err (!%p235_p7)
}
  0x12   :  { %22 = dma.hbm_to_vmem [thread:$0]  %s383_s0, 128, %s20_s19, [#allocation3]  }
  0x13   :  { %s239_s9 = scalar_lea.hbm %s384_s1, 512 }
  0x14   :  { %p240_p8 = scmp.ne.s32.totalorder %s384_s1, %s239_s9  ;;  %p243_p9 = scmp.lt.u32.totalorder %s239_s9, %s384_s1 }
  0x16   :  { %p245_p10 = pnand %p243_p9, %p240_p8 }
  0x18   :  { %248 = shalt.err (!%p245_p10)
}
  0x19   :  { %s249_s14 = scalar_lea.vmem %s327_s21, 512  ;;  %p254_p12 = scmp.lt.s32.totalorder %s327_s21, %s327_s21 }
  0x1a   :  { %p250_p11 = scmp.ne.s32.totalorder %s327_s21, %s249_s14  ;;  %p255_p13 = scmp.lt.s32.totalorder %s249_s14, %s249_s14 }
  0x1c   :  { %p256_p0 = por %p255_p13, %p254_p12 }
  0x1e   :  { %p257_p1 = pnand %p256_p0, %p250_p11 }
  0x20   :  { %260 = shalt.err (!%p257_p1)
}
  0x21   :  { %s291_s0 = smov 128   ;;  %s292_s15 = smov 8  }
  0x22   :  { %34 = dma.hbm_to_vmem [thread:$0]  %s384_s1, 512, %s327_s21, [#allocation6], %s291_s0, %s291_s0, %s292_s15  }
  0x23   :  { %283 = dma.done.wait [#allocation3], 128  }
  0x24   :  { %284 = vsyncadd [#allocation3], 4294967168 }
  0x25   :  { %285 = dma.done.wait [#allocation6], 512  }
  0x26   :  { %286 = vsyncadd [#allocation6], 4294966784  ;;  %vm50_vm0 = vcmask 261120   ;;  %v47_v0 = vld [vmem:[#allocation2] sm:$0xff]  ;;  %v79_v7 = vld [vmem:[#allocation5] sm:$0xff]  ;;  %v293_v10 = vmov 0.0|0.0  }
  0x27   :  { %v51_v1 = vsel %vm50_vm0, %v47_v0, 0.0  ;;  %v80_v8 = vld [vmem:[#allocation5 + $0x8] sm:$0xff]  ;;  %v81_v9 = vld [vmem:[#allocation5 + $0x10] sm:$0xff]  ;;  %201 = vmatprep.subr.bf16.mxu0 %v293_v10  ;;  %v82_v12 = vld [vmem:[#allocation5 + $0x18] sm:$0xff]  ;;  %vm294_vm1 = vmmov 0   ;;  %v295_v13 = vmov 0.0  }
  0x28   :  { %52 = vadd.xlane.f32.xlu0 %v51_v1  ;;  %v202_v11 = vpack.c.bf16 %v80_v8, %v79_v7  ;;  %198 = vmatprep.mubr.msk.f32.mxu0 %vm294_vm1, %v295_v13  ;;  %v205_v14 = vpack.c.bf16 %v82_v12, %v81_v9  ;;  %v181_v19 = vld [vmem:[%s386_s3] ss:$0 sm:$0xff]  ;;  %s296_s23 = smov [#allocation7]  }
  0x29   :  { %v182_v21 = vld [vmem:[%s387_s4] ss:$0 sm:$0xff]  ;;  %s171_s24 = sshll.u32 %s296_s23, 4  ;;  %s172_s24 = int_to_ptr.vmem [resolvable:$true] %s171_s24 }
  0x2a   :  { %203 = vmatpush3.bf16.msra.mxu0 %v202_v11  ;;  %v183_v24 = vld [vmem:[%s385_s2] ss:$0 sm:$0xff]  ;;  %s261_s3 = scalar_lea.vmem %s172_s24, 128  ;;  %p266_p3 = scmp.lt.s32.totalorder %s172_s24, %s172_s24 }
  0x2b   :  { %204 = vmatprep.subr.bf16.mxu0 %v293_v10  ;;  %p262_p2 = scmp.ne.s32.totalorder %s172_s24, %s261_s3  ;;  %p267_p4 = scmp.lt.s32.totalorder %s261_s3, %s261_s3 }
  0x2d   :  { %p268_p5 = por %p267_p4, %p266_p3 }
  0x2e   :  { %206 = vmatpush3.bf16.msra.mxu0 %v205_v14 }
  0x2f   :  { %p269_p6 = pnand %p268_p5, %p262_p2 }
  0xb5   :  { %v53_v2 = vpop.xlane.xlu0 %52 }
  0xb6   :  { %v55_v3 = vmul.f32 0.03125, %v53_v2 }
  0xb8   :  { %v56_v4 = vsub.f32 %v47_v0, %v55_v3 }
  0xba   :  { %v57_v5 = vmul.f32 %v56_v4, %v56_v4 }
  0xbc   :  { %v58_v6 = vsel %vm50_vm0, %v57_v5, 0.0 }
  0xbd   :  { %59 = vadd.xlane.f32.xlu0 %v58_v6 }
 0x14a   :  { %v60_v15 = vpop.xlane.xlu0 %59 }
 0x14b   :  { %v61_v16 = vmul.f32 0.03125, %v60_v15 }
 0x14d   :  { %v62_v17 = vadd.f32 1e-05, %v61_v16 }
 0x14f   :  { %215 = vrsqrt.f32 %v62_v17 }
 0x159   :  { %v216_v18 = vpop.eup %215 }
 0x15a   :  { %v64_v20 = vmul.f32 %v216_v18, %v56_v4 }
 0x15c   :  { %v71_v22 = vmul.f32 %v181_v19, %v64_v20 }
 0x15e   :  { %v78_v23 = vadd.f32 %v182_v21, %v71_v22 }
 0x160   :  { %199 = vmatmul.mubr.msk.f32.vlgmr.msra.gmra.mrb[0].mxu0 %vm50_vm0, %v78_v23 }
 0x233   :  { %v159_v25 = vpop.f32.mrb[0].mxu0 }
 0x234   :  { %v160_v26 = vadd.f32 %v183_v24, %v159_v25  ;;  %v200_v27 = vpop.f32.mrb[1].mxu0 }
 0x236   :  { %v163_v28 = vadd.f32 %v160_v26, %v78_v23 }
 0x238   :  { %164 = vst.msk [vmem:[#allocation7] sm:$0xff] %vm50_vm0, %v163_v28 }
 0x239   :  { %272 = shalt.err (!%p269_p6)
}
 0x23a   :  { %s273_s2 = scalar_lea.hbm %s388_s5, 128 }
 0x23b   :  { %p274_p7 = scmp.ne.s32.totalorder %s388_s5, %s273_s2  ;;  %p277_p8 = scmp.lt.u32.totalorder %s273_s2, %s388_s5 }
 0x23d   :  { %p279_p9 = pnand %p277_p8, %p274_p7 }
 0x23f   :  { %282 = shalt.err (!%p279_p9)
}
 0x240   :  { %174 = dma.vmem_to_hbm [thread:$0]  %s172_s24, 128, %s388_s5, [#allocation4]  }
 0x241   :  { %287 = dma.done.wait [#allocation4], 128  }
 0x242   :  { %288 = vsyncadd [#allocation4], 4294967168 }
 0x243   :  { %178 = vsyncpa [#allocation3], 1 }
 0x244   :  { %179 = vsyncpa [#allocation6], 1 }
 0x245   :  { %180 = vsyncpa [#allocation4], 1 }

</bundles_post_ra>
